<compile_context>
chip_gen: v5e
topology: v5e:2x2
jax: 0.10.0
libtpu: 0.0.40
codegen_flags: <defaults>
</compile_context>

<pallas_src>
import functools
import math

import jax
import jax.numpy as jnp
from jax import lax
from jax.experimental import pallas as pl
from jax.experimental.pallas import tpu as pltpu


def _ceil_div(a, b):
    return -(-a // b)


def _round_up(a, b):
    return _ceil_div(a, b) * b


def _sse_kernel(pred_ref, tgt_ref, out_ref, acc_ref, *,
                rows, tile_rows, lanes, tiles_per_split, splits, ragged, toy):
    """Accumulate per-(sublane,lane) sums of squared differences for one image.

    pred_ref / tgt_ref : (1, TR, LANE) or (1, 3, TR, LANE) input tiles
    out_ref            : (1, 1, 8, LANE) per-(image,split) partial sums
    acc_ref            : (8, LANE) f32 VMEM accumulator (persists over the
                         reduction grid axis)
    """
    s = pl.program_id(1)
    t = pl.program_id(2)

    @pl.when(t == 0)
    def _init():
        acc_ref[...] = jnp.zeros_like(acc_ref)

    if toy:
        # Fused RGB->Y: Y = (sum_c coef_c * x_c + 16)/255; the +16 cancels in
        # the difference, so only the coefficient mix (scaled by 1/255) remains.
        d0 = pred_ref[0, 0].astype(jnp.float32) - tgt_ref[0, 0].astype(jnp.float32)
        d1 = pred_ref[0, 1].astype(jnp.float32) - tgt_ref[0, 1].astype(jnp.float32)
        d2 = pred_ref[0, 2].astype(jnp.float32) - tgt_ref[0, 2].astype(jnp.float32)
        y = (d0 * (65.481 / 255.0) + d1 * (128.553 / 255.0) + d2 * (24.966 / 255.0))
        sq = y * y                                             # (TR, LANE)
    else:
        d = pred_ref[0].astype(jnp.float32) - tgt_ref[0].astype(jnp.float32)
        sq = d * d                                             # (TR, LANE)

    def _accumulate(x):
        # (TR, LANE) -> (TR//8, 8, LANE): pure vreg-aligned VALU adds into a
        # full (8, LANE) accumulator; no per-step cross-sublane reduce.
        acc_ref[...] += jnp.sum(x.reshape(tile_rows // 8, 8, lanes), axis=0)

    if ragged:
        is_last = jnp.logical_and(s == splits - 1, t == tiles_per_split - 1)

        @pl.when(jnp.logical_not(is_last))
        def _full():
            _accumulate(sq)

        @pl.when(is_last)
        def _masked():
            g = s * tiles_per_split + t
            row = lax.broadcasted_iota(jnp.int32, (tile_rows, 1), 0) + g * tile_rows
            _accumulate(jnp.where(row < rows, sq, 0.0))
    else:
        _accumulate(sq)

    @pl.when(t == tiles_per_split - 1)
    def _finalize():
        out_ref[...] = acc_ref[...].reshape(1, 1, 8, lanes)


def psnr_loss(pred, target, loss_weight=1.0, toY=False, eps=1e-8, *,
              max_block_bytes=8 * 1024 * 1024):
    """Pallas equivalent of PSNRLoss.forward (reduction='mean')."""
    assert pred.ndim == 4 and target.shape == pred.shape
    scale = 10.0 / math.log(10.0)
    N, C, H, W = pred.shape
    LANE = 128

    itemsize = pred.dtype.itemsize
    pack = max(8, 32 // itemsize)          # 8 for f32, 16 for bf16, 32 for 1-byte
    unit = LANE * pack

    if toY:
        assert C == 3, "toY requires 3-channel (RGB) inputs"
        denom = H * W                      # Y image: mean over (1, H, W)
        S = H * W
        S_pad = _round_up(S, unit)
        p = pred.reshape(N, 3, S)
        q = target.reshape(N, 3, S)
        if S_pad != S:                     # zero diff contributes 0 to the SSE
            p = jnp.pad(p, ((0, 0), (0, 0), (0, S_pad - S)))
            q = jnp.pad(q, ((0, 0), (0, 0), (0, S_pad - S)))
        R = S_pad // LANE
        p = p.reshape(N, 3, R, LANE)
        q = q.reshape(N, 3, R, LANE)
        ch = 3
    else:
        denom = C * H * W
        M = C * H * W
        M_pad = _round_up(M, unit)
        p = pred.reshape(N, M)
        q = target.reshape(N, M)
        if M_pad != M:                     # zero diff contributes 0 to the SSE
            p = jnp.pad(p, ((0, 0), (0, M_pad - M)))
            q = jnp.pad(q, ((0, 0), (0, M_pad - M)))
        R = M_pad // LANE
        p = p.reshape(N, R, LANE)
        q = q.reshape(N, R, LANE)
        ch = 1

    # Row-tile size: largest multiple of `pack` whose per-input block fits
    # `max_block_bytes` (default 8 MiB -> double-buffered 2-input footprint of
    # 32 MiB, safe for v7x's 64 MiB VMEM while amortizing per-step overhead).
    cap = max(pack, (max_block_bytes // (ch * LANE * itemsize)) // pack * pack)
    TR = min(R, cap)
    n_tiles = _ceil_div(R, TR)
    ragged = (R % TR) != 0

    # v7x has 2 TensorCores sharded along the "parallel" axes; if the batch
    # alone can't feed both, split the row-tile reduction 2-way.
    SPLITS = 2 if (N == 1 and n_tiles >= 2 and n_tiles % 2 == 0) else 1
    tps = n_tiles // SPLITS

    kern = functools.partial(
        _sse_kernel, rows=R, tile_rows=TR, lanes=LANE,
        tiles_per_split=tps, splits=SPLITS, ragged=ragged, toy=toY)

    if toY:
        in_specs = [
            pl.BlockSpec((1, 3, TR, LANE), lambda b, s, t: (b, 0, s * tps + t, 0)),
            pl.BlockSpec((1, 3, TR, LANE), lambda b, s, t: (b, 0, s * tps + t, 0)),
        ]
    else:
        in_specs = [
            pl.BlockSpec((1, TR, LANE), lambda b, s, t: (b, s * tps + t, 0)),
            pl.BlockSpec((1, TR, LANE), lambda b, s, t: (b, s * tps + t, 0)),
        ]

    # 2 inputs x 2 pipeline buffers of the block, plus output/scratch headroom;
    # capped at 48 MiB so it stays inside v7x's 64 MiB physical VMEM.
    block_bytes = ch * TR * LANE * itemsize
    vmem_limit = int(min(max(4 * block_bytes + (4 << 20), 32 << 20), 48 << 20))

    partials = pl.pallas_call(
        kern,
        out_shape=jax.ShapeDtypeStruct((N, SPLITS, 8, LANE), jnp.float32),
        grid_spec=pltpu.PrefetchScalarGridSpec(
            num_scalar_prefetch=0,
            grid=(N, SPLITS, tps),
            in_specs=in_specs,
            out_specs=pl.BlockSpec((1, 1, 8, LANE), lambda b, s, t: (b, s, 0, 0)),
            scratch_shapes=[pltpu.VMEM((8, LANE), jnp.float32)],
        ),
        compiler_params=pltpu.CompilerParams(
            dimension_semantics=("parallel", "parallel", "arbitrary"),
            vmem_limit_bytes=vmem_limit,
        ),
    )(p, q)

    sse = jnp.sum(partials, axis=(1, 2, 3))     # per-image sum of squared diffs
    mse = sse / float(denom)                    # mean over (C, H, W)
    return loss_weight * scale * jnp.mean(jnp.log(mse + eps))


def _psnr_reference(pred, target, loss_weight=1.0, toY=False, eps=1e-8):
    """Pure-JAX reference mirroring the PyTorch module (for verification)."""
    scale = 10.0 / math.log(10.0)
    pred = pred.astype(jnp.float32)
    target = target.astype(jnp.float32)
    if toY:
        coef = jnp.array([65.481, 128.553, 24.966], dtype=jnp.float32).reshape(1, 3, 1, 1)
        pred = ((pred * coef).sum(axis=1, keepdims=True) + 16.0) / 255.0
        target = ((target * coef).sum(axis=1, keepdims=True) + 16.0) / 255.0
    mse = jnp.mean((pred - target) ** 2, axis=(1, 2, 3))
    return loss_weight * scale * jnp.mean(jnp.log(mse + eps))


if __name__ == "__main__":
    key = jax.random.PRNGKey(0)
    ks = jax.random.split(key, 6)

    # --- 1. default path (toY=False), lane-dense, single tile, no padding ---
    pred = jax.random.uniform(ks[0], (2, 4, 16, 16), dtype=jnp.float32)
    target = pred + 0.05 * jax.random.normal(ks[1], (2, 4, 16, 16), dtype=jnp.float32)
    out = jax.block_until_ready(psnr_loss(pred, target))
    ref = jax.block_until_ready(_psnr_reference(pred, target))
    assert jnp.allclose(out, ref, rtol=1e-5, atol=1e-5), (out, ref)

    # --- 2. ragged flat size (zero-padded to 128*pack), with loss_weight ---
    p2 = jax.random.uniform(ks[2], (2, 3, 10, 20), dtype=jnp.float32)
    t2 = p2 + 0.1 * jax.random.normal(ks[3], (2, 3, 10, 20), dtype=jnp.float32)
    out2 = jax.block_until_ready(psnr_loss(p2, t2, loss_weight=0.5))
    ref2 = jax.block_until_ready(_psnr_reference(p2, t2, loss_weight=0.5))
    assert jnp.allclose(out2, ref2, rtol=1e-5, atol=1e-5), (out2, ref2)

    # --- 3. fused toY path (in-kernel RGB->Y mix) ---
    out3 = jax.block_until_ready(psnr_loss(p2, t2, toY=True))
    ref3 = jax.block_until_ready(_psnr_reference(p2, t2, toY=True))
    assert jnp.allclose(out3, ref3, rtol=1e-4, atol=1e-5), (out3, ref3)

    # --- 4. bf16 inputs (TR rounded to 16, f32 accumulation in-kernel) ---
    pb = pred.astype(jnp.bfloat16)
    tb = target.astype(jnp.bfloat16)
    out4 = jax.block_until_ready(psnr_loss(pb, tb))
    ref4 = jax.block_until_ready(_psnr_reference(pb, tb))
    assert jnp.allclose(out4, ref4, rtol=1e-4, atol=1e-4), (out4, ref4)

    # --- 5. N=1 multi-tile: 2-way split across the reduction + gated ragged
    #        last-tile mask (tiny max_block_bytes forces multiple row tiles) ---
    p5 = jax.random.uniform(ks[4], (1, 3, 25, 40), dtype=jnp.float32)
    t5 = p5 + 0.1 * jax.random.normal(ks[5], (1, 3, 25, 40), dtype=jnp.float32)
    out5 = jax.block_until_ready(psnr_loss(p5, t5, max_block_bytes=16 * 128 * 4))
    ref5 = jax.block_until_ready(_psnr_reference(p5, t5))
    assert jnp.allclose(out5, ref5, rtol=1e-5, atol=1e-5), (out5, ref5)

    print("KERNEL_OK")
</pallas_src>

<mosaic_0001>
module attributes {stable_mosaic.version = 11 : i64} {
  func.func @_sse_kernel(%arg0: i32, %arg1: i32, %arg2: i32, %arg3: memref<1x8x128xf32, #tpu.memory_space<vmem>>, %arg4: memref<1x8x128xf32, #tpu.memory_space<vmem>>, %arg5: memref<1x1x8x128xf32, #tpu.memory_space<vmem>>, %arg6: memref<8x128xf32, #tpu.memory_space<vmem>>) attributes {dimension_semantics = [#tpu.dimension_semantics<parallel>, #tpu.dimension_semantics<parallel>, #tpu.dimension_semantics<arbitrary>], iteration_bounds = array<i64: 2, 1, 1>, scalar_prefetch = 0 : i64, scratch_operands = 1 : i64, tpu.core_type = #tpu.core_type<tc>, window_params = [{transform_indices = @transform_0, window_bounds = array<i64: 1, 8, 128>}, {transform_indices = @transform_1, window_bounds = array<i64: 1, 8, 128>}, {transform_indices = @transform_2, window_bounds = array<i64: 1, 1, 8, 128>}]} {
    %c0_i32 = arith.constant 0 : i32
    %0 = arith.cmpi eq, %arg2, %c0_i32 : i32
    %1 = arith.extui %0 : i1 to i32
    %c0_i32_0 = arith.constant 0 : i32
    %2 = arith.cmpi ne, %1, %c0_i32_0 : i32
    scf.if %2 {
      %cst_12 = arith.constant 0.000000e+00 : f32
      %17 = vector.broadcast %cst_12 : f32 to vector<8x128xf32>
      %c0_13 = arith.constant 0 : index
      %c0_14 = arith.constant 0 : index
      %18 = vector.load %arg6[%c0_13, %c0_14] : memref<8x128xf32, #tpu.memory_space<vmem>>, vector<8x128xf32>
      tpu.vector_store %arg6[%c0_13, %c0_14], %17 {strides = array<i32>} : memref<8x128xf32, #tpu.memory_space<vmem>>, vector<8x128xf32>,
    } else {
    }
    %c0 = arith.constant 0 : index
    %c0_1 = arith.constant 0 : index
    %c0_2 = arith.constant 0 : index
    %3 = vector.load %arg3[%c0, %c0_1, %c0_2] : memref<1x8x128xf32, #tpu.memory_space<vmem>>, vector<1x8x128xf32>
    %4 = vector.shape_cast %3 : vector<1x8x128xf32> to vector<8x128xf32>
    %c0_3 = arith.constant 0 : index
    %c0_4 = arith.constant 0 : index
    %c0_5 = arith.constant 0 : index
    %5 = vector.load %arg4[%c0_3, %c0_4, %c0_5] : memref<1x8x128xf32, #tpu.memory_space<vmem>>, vector<1x8x128xf32>
    %6 = vector.shape_cast %5 : vector<1x8x128xf32> to vector<8x128xf32>
    %7 = arith.subf %4, %6 : vector<8x128xf32>
    %8 = arith.mulf %7, %7 : vector<8x128xf32>
    %c0_6 = arith.constant 0 : index
    %c0_7 = arith.constant 0 : index
    %9 = vector.load %arg6[%c0_6, %c0_7] : memref<8x128xf32, #tpu.memory_space<vmem>>, vector<8x128xf32>
    %10 = vector.shape_cast %8 : vector<8x128xf32> to vector<1x8x128xf32>
    %cst = arith.constant dense<0.000000e+00> : vector<8x128xf32>
    %11 = vector.multi_reduction <add>, %10, %cst [0] : vector<1x8x128xf32> to vector<8x128xf32>
    %12 = arith.addf %9, %11 : vector<8x128xf32>
    %c0_8 = arith.constant 0 : index
    %c0_9 = arith.constant 0 : index
    %13 = vector.load %arg6[%c0_8, %c0_9] : memref<8x128xf32, #tpu.memory_space<vmem>>, vector<8x128xf32>
    tpu.vector_store %arg6[%c0_8, %c0_9], %12 {strides = array<i32>} : memref<8x128xf32, #tpu.memory_space<vmem>>, vector<8x128xf32>,
    %c0_i32_10 = arith.constant 0 : i32
    %14 = arith.cmpi eq, %arg2, %c0_i32_10 : i32
    %15 = arith.extui %14 : i1 to i32
    %c0_i32_11 = arith.constant 0 : i32
    %16 = arith.cmpi ne, %15, %c0_i32_11 : i32
    scf.if %16 {
      %c0_12 = arith.constant 0 : index
      %c0_13 = arith.constant 0 : index
      %17 = vector.load %arg6[%c0_12, %c0_13] : memref<8x128xf32, #tpu.memory_space<vmem>>, vector<8x128xf32>
      %18 = vector.shape_cast %17 : vector<8x128xf32> to vector<1x1x8x128xf32>
      %c0_14 = arith.constant 0 : index
      %c0_15 = arith.constant 0 : index
      %c0_16 = arith.constant 0 : index
      %c0_17 = arith.constant 0 : index
      %19 = vector.load %arg5[%c0_14, %c0_15, %c0_16, %c0_17] : memref<1x1x8x128xf32, #tpu.memory_space<vmem>>, vector<1x1x8x128xf32>
      tpu.vector_store %arg5[%c0_14, %c0_15, %c0_16, %c0_17], %18 {strides = array<i32>} : memref<1x1x8x128xf32, #tpu.memory_space<vmem>>, vector<1x1x8x128xf32>,
    } else {
    }
    return
  }
  func.func @transform_0(%arg0: i32, %arg1: i32, %arg2: i32) -> (i32, i32, i32) {
    %c1_i32 = arith.constant 1 : i32
    %0 = arith.muli %arg1, %c1_i32 : i32
    %1 = arith.addi %0, %arg2 : i32
    %c0_i32 = arith.constant 0 : i32
    %c0_i32_0 = arith.constant 0 : i32
    return %arg0, %1, %c0_i32 : i32, i32, i32
  }
  func.func @transform_1(%arg0: i32, %arg1: i32, %arg2: i32) -> (i32, i32, i32) {
    %c1_i32 = arith.constant 1 : i32
    %0 = arith.muli %arg1, %c1_i32 : i32
    %1 = arith.addi %0, %arg2 : i32
    %c0_i32 = arith.constant 0 : i32
    %c0_i32_0 = arith.constant 0 : i32
    return %arg0, %1, %c0_i32 : i32, i32, i32
  }
  func.func @transform_2(%arg0: i32, %arg1: i32, %arg2: i32) -> (i32, i32, i32, i32) {
    %c0_i32 = arith.constant 0 : i32
    %c0_i32_0 = arith.constant 0 : i32
    %c0_i32_1 = arith.constant 0 : i32
    return %arg0, %arg1, %c0_i32, %c0_i32_0 : i32, i32, i32, i32
  }
}

</mosaic_0001>

<bundles_post_ra>
// kernel: tpu_custom_call.1
= control target key start
LH: loop header
LB: loop body
LE: loop exit
PB: predicated region body
PF: predicated region fallthrough
CT: control target
= control target key end

     0   :  { %7 = vsyncpa [#allocation4], 0  ;;  %s753_s0 = inlined_call_operand.hbm [shape: f32[2,8,128], index: 0, kind: input, shape index: {}]   ;;  %s754_s1 = inlined_call_operand.hbm [shape: f32[2,8,128], index: 1, kind: input, shape index: {}]   ;;  %s755_s2 = inlined_call_operand.hbm [shape: f32[2,1,8,128], index: 2, kind: output, shape index: {}]  }
   0x1   :  { %9 = vsyncpa [#allocation4 + $0x1], 0 }
   0x2   :  { %10 = vsyncpa [#allocation7], 0 }
   0x3   :  { %12 = vsyncpa [#allocation7 + $0x1], 0 }
   0x4   :  { %13 = vsyncpa [#allocation5], 0 }
   0x5   :  { %15 = vsyncpa [#allocation5 + $0x1], 0  ;;  %s625_s9 = smov 0   ;;  %s627_s10 = smov 0  }
   0x6   :  { %s629_s11 = smov 0   ;;  %s631_s12 = smov 0  }
   0x7   :  { %s633_s13 = smov 0   ;;  %s635_s14 = smov 0  }
   0x8 LB: > { %s379_s15 = sadd.s32 4294967295, %s608_s14   ;;  %s380_s16 = sadd.s32 4294967294, %s608_s14   ;;  %s608_s14 = sphi %s635_s14, %s21_s14   ;;  %s604_s13 = sphi %s633_s13, %s764_s13   ;;  %s600_s12 = sphi %s631_s12, %s763_s12   ;;  %s596_s11 = sphi %s629_s11, %s762_s11   ;;  %s592_s10 = sphi %s627_s10, %s761_s10   ;;  %s588_s9 = sphi %s625_s9, %s760_s9  }
   0x9   : > { %s40_s17 = sadd.s32 1, %s604_s13  ;;  %s51_s18 = sadd.s32 1, %s596_s11 }
   0xa   : > { %p42_p0 = scmp.ge.s32.totalorder %s40_s17, 2  ;;  %p58_p1 = scmp.ne.s32.totalorder %s596_s11, %s592_s10 }
   0xb   : > { %p59_p2 = scmp.eq.s32.totalorder %s608_s14, 0  ;;  %p64_p3 = scmp.ne.s32.totalorder %s592_s10, %s588_s9 }
   0xc   : > { %s766_s17 = smov (%p42_p0, %s40_s17), 0  ;;  %p65_p5 = scmp.eq.s32.totalorder %s379_s15, 0 }
   0xd   : > { %p666_p4 = por %p59_p2, %p58_p1  ;;  %s46_s20 = ssub.s32 %s604_s13, %s766_s17 }
   0xe   : > { %p120_p6 = scmp.eq.s32.totalorder %s379_s15, 1  ;;  %p49_p7 = scmp.eq.s32.totalorder %s46_s20, 0 }
   0xf   : > { %p672_p8 = por %p65_p5, %p64_p3  ;;  %p126_p10 = scmp.eq.s32.totalorder %s380_s16, 1 }
  0x10   : > { %p676_p9 = por %p120_p6, %p58_p1  ;;  %p382_p12 = scmp.ge.s32.totalorder %s608_s14, 2 }
  0x11   : > { %s681_s23 = scalar_select %p49_p7, %s596_s11, %s51_s18  }
  0x12   : > { %p683_p11 = por %p126_p10, %p64_p3  ;;  %p412_p13 = scmp.lt.s32.totalorder %s608_s14, 2 }
  0x13   : > { %s146_s25 = sand.u32 1, %s596_s11   ;;  %s384_s27 = sshll.u32 %s604_s13, 3 }
  0x14   : > { %s383_s26 = sshll.u32 %s146_s25, 3  ;;  %s156_s30 = scalar_lea.hbm %s753_s0, %s384_s27 }
  0x15   : > { %s150_s3 = scalar_lea.vmem [#allocation3], %s383_s26  ;;  %s158_s5 = sshll.u32 %s156_s30, 4  ;;  %s159_s5 = int_to_ptr.hbm [resolvable:$true] %s158_s5 }
  0x16   : > { %s160_s4 = sshll.u32 %s150_s3, 4  ;;  %p402_p0 = pnand %p412_p13, %p666_p4  ;;  %s161_s4 = int_to_ptr.vmem [resolvable:$true] %s160_s4 }
  0x17   : > { %p387_p1 = scmp.ge.s32.totalorder %s608_s14, 1  ;;  %p186_p2 = scmp.lt.s32.totalorder %s608_s14, 3 }
  0x18   : > { %s147_s6 = scalar_lea.sflag [#allocation4], %s146_s25  ;;  %s177_s15 = scalar_lea.hbm %s754_s1, %s384_s27 }
  0x19   : > { %404 = dma.hbm_to_vmem [thread:$0]  (!%p402_p0), %s159_s5, 128, %s161_s4, %s147_s6  }
  0x1a   : > { %p187_p3 = pnand %p387_p1, %p186_p2  ;;  %s171_s16 = scalar_lea.vmem [#allocation6], %s383_s26 }
  0x1b   : > { %s181_s18 = sshll.u32 %s171_s16, 4  ;;  %s179_s20 = sshll.u32 %s177_s15, 4  ;;  %s182_s18 = int_to_ptr.vmem [resolvable:$true] %s181_s18  ;;  %s180_s20 = int_to_ptr.hbm [resolvable:$true] %s179_s20 }
  0x1c   : > { %s168_s28 = scalar_lea.sflag [#allocation7], %s146_s25  ;;  %190 = sbr.rel (%p187_p3) target bundleno = 51 (0x33), region = 28 }
  0x1d   : > { %407 = dma.hbm_to_vmem [thread:$0]  (!%p402_p0), %s180_s20, 128, %s182_s18, %s168_s28  }
  0x1e   : > { %s702_s19 = sand.u32 (!%p187_p3), 1, %s592_s10  }
  0x1f   : > { %s388_s29 = sshll.u32 (!%p187_p3), %s702_s19, 3  ;;  %s193_s30 = scalar_lea.sflag (!%p187_p3), [#allocation4], %s702_s19 }
  0x20   : > { %s196_s3 = scalar_lea.vmem (!%p187_p3), [#allocation3], %s388_s29 }
  0x21   : > { %575 = dma.done.wait (%p672_p8), %s193_s30, 128  }
  0x22   : > { %577 = vsyncadd (%p672_p8), %s193_s30, 4294967168  ;;  %s203_s26 = scalar_lea.sflag [#allocation7], %s702_s19  ;;  %s206_s25 = scalar_lea.vmem [#allocation6], %s388_s29 }
  0x23   : > { %579 = dma.done.wait (%p672_p8), %s203_s26, 128  }
  0x24   : > { %581 = vsyncadd (%p672_p8), %s203_s26, 4294967168  ;;  %s392_s27 = sshll.u32 %s600_s12, 3  ;;  %v240_v0 = vld [vmem:[%s196_s3] sm:$0xff]  ;;  %v241_v1 = vld [vmem:[%s206_s25] sm:$0xff]  ;;  %s232_s7 = scalar_lea.vmem [#allocation8], %s388_s29 }
  0x25   : > { %s265_s6 = scalar_lea.hbm %s755_s2, %s392_s27  ;;  %s267_s8 = sshll.u32 %s232_s7, 4  ;;  %v242_v2 = vsub.f32 %v240_v0, %v241_v1  ;;  %s268_s8 = int_to_ptr.vmem [resolvable:$true] %s267_s8 }
  0x26   : > { %s269_s15 = sshll.u32 %s265_s6, 4  ;;  %s254_s21 = scalar_lea.sflag [#allocation5], %s702_s19  ;;  %s270_s15 = int_to_ptr.hbm [resolvable:$true] %s269_s15 }
  0x27   : > { %v243_v3 = vmul.f32 %v242_v2, %v242_v2  ;;  %s536_s16 = sshra.s32 %s270_s15, 4  ;;  %s542_s28 = scalar_lea.hbm %s755_s2, 16  ;;  %s537_s16 = int_to_ptr.hbm [resolvable:$true] %s536_s16 }
  0x28   : > { %s538_s18 = scalar_lea.hbm %s537_s16, 8  ;;  %p543_p7 = scmp.lt.s32.totalorder %s537_s16, %s755_s2 }
  0x29   : > { %252 = vst [vmem:[%s232_s7] sm:$0xff] %v243_v3  ;;  %p539_p4 = scmp.ne.s32.totalorder %s537_s16, %s538_s18  ;;  %p544_p8 = scmp.lt.s32.totalorder %s542_s28, %s538_s18 }
  0x2b   : > { %p540_p5 = pnand %p539_p4, %p676_p9  ;;  %p545_p10 = por %p544_p8, %p543_p7 }
  0x2d   : > { %p541_p6 = pneg %p540_p5 }
  0x2f   : > { %p546_p13 = pnand %p545_p10, %p541_p6 }
  0x31   : > { %549 = shalt.err (!%p546_p13)
}
  0x32   : > { %399 = dma.vmem_to_hbm [thread:$0]  (%p676_p9), %s268_s8, 128, %s270_s15, %s254_s21  }
  0x33 PF: > { %s281_s19 = sand.u32 1, %s588_s9   ;;  %p409_p0 = pnand %p382_p12, %p683_p11 }
  0x34   : > { %s282_s3 = scalar_lea.sflag [#allocation5], %s281_s19 }
  0x35   : > { %p410_p1 = pneg %p409_p0 }
  0x37   : > { %583 = dma.done.wait (%p410_p1), %s282_s3, 128  }
  0x38   : > { %585 = vsyncadd (%p410_p1), %s282_s3, 4294967168  ;;  %s21_s14 = sadd.s32 1, %s608_s14   ;;  %s760_s9 = smov %s592_s10 }
  0x39   : > { %p18_p2 = scmp.ge.s32.totalorder %s21_s14, 4   ;;  %s761_s10 = smov %s596_s11 }
  0x3a   : > { %s762_s11 = smov %s681_s23  ;;  %s763_s12 = smov %s604_s13 }
  0x3b   : > { %s764_s13 = smov %s766_s17  ;;  %20 = sbr.rel (!%p18_p2) target bundleno = 8 (0x8), region = 94 }
  0x40   :  { %288 = vsyncpa [#allocation4], 1 }
  0x41   :  { %290 = vsyncpa [#allocation4 + $0x1], 1 }
  0x42   :  { %291 = vsyncpa [#allocation7], 1 }
  0x43   :  { %293 = vsyncpa [#allocation7 + $0x1], 1 }
  0x44   :  { %294 = vsyncpa [#allocation5], 1 }
  0x45   :  { %296 = vsyncpa [#allocation5 + $0x1], 1 }

</bundles_post_ra>
